<compile_context>
chip_gen: v5e
topology: v5e:2x2
jax: 0.10.0
libtpu: 0.0.40
codegen_flags: <defaults>
</compile_context>

<pallas_src>
import jax
import jax.numpy as jnp
from jax.experimental import pallas as pl
from jax.experimental.pallas import tpu as pltpu


def _vmem_budget_and_limit():
    """Per-generation block budget and scoped VMEM limit (bytes)."""
    try:
        kind = jax.devices()[0].device_kind.lower()
    except Exception:
        kind = ""
    if "v5" in kind or "v6" in kind:
        # 128 MiB physical VMEM: larger blocks, fewer grid steps, bigger DMAs.
        return 48 * 1024 * 1024, 64 * 1024 * 1024
    # v7x (64 MiB physical per TensorCore) / unknown: stay conservative.
    return 20 * 1024 * 1024, 32 * 1024 * 1024


def _largest_divisor_leq(n: int, cap: int) -> int:
    cap = max(1, min(cap, n))
    for d in range(cap, 0, -1):
        if n % d == 0:
            return d
    return 1


def global_pad(x: jax.Array, pad=1) -> jax.Array:
    """Global lat/lon padding: circular along W, reflect along H."""
    if isinstance(pad, int):
        ph = pw = pad
    else:
        ph, pw = pad

    N, C, H, W = x.shape
    Ho, Wo = H + 2 * ph, W + 2 * pw
    assert ph == 0 or H >= ph + 1, "reflect padding requires H > pad"
    assert W >= pw, "circular padding requires W >= pad"

    NC = N * C
    xf = x.reshape(NC, H, W)  # free reshape: fold (N, C) into one block axis

    # ---- layout-aware VMEM sizing (tiles are (sublane, 128-lane) padded) ----
    itemsize = jnp.dtype(x.dtype).itemsize
    sublane = max(8, 32 // itemsize)  # 8 for f32, 16 for bf16, 32 for int8

    def _tiled_elems(h, w):
        return (-(-h // sublane) * sublane) * (-(-w // 128) * 128)

    per_ch_bytes = (_tiled_elems(H, W) + _tiled_elems(Ho, Wo)) * itemsize

    budget_bytes, vmem_limit = _vmem_budget_and_limit()
    # double-buffered input + output blocks must fit in the budget
    tc_cap = max(1, budget_bytes // (2 * per_ch_bytes))
    if NC >= 2:
        tc_cap = min(tc_cap, NC // 2)  # >= 2 grid steps: keep both v7x cores busy
    TC = _largest_divisor_leq(NC, tc_cap)
    num_blocks = NC // TC

    # ---- kernel --------------------------------------------------------------
    def kernel(x_ref, o_ref):
        # Compose the W-circular halo once: (TC, H, Wo), derived from the input.
        if pw > 0:
            xw = jnp.concatenate(
                [x_ref[:, :, W - pw:], x_ref[...], x_ref[:, :, :pw]], axis=-1)
        else:
            xw = x_ref[...]

        # Interior rows (+ W halo): one full-width store.
        o_ref[:, ph:ph + H, :] = xw

        # H-reflect halo, written from the input-derived value (no o_ref read):
        #   output row r (< ph)    = padded-input row ph - r
        #   output row ph + H + s  = padded-input row H - 2 - s
        for r in range(ph):
            src = ph - r
            o_ref[:, r:r + 1, :] = xw[:, src:src + 1, :]
        for s in range(ph):
            src = H - 2 - s
            o_ref[:, ph + H + s:ph + H + s + 1, :] = xw[:, src:src + 1, :]

    bytes_accessed = NC * (H * W + Ho * Wo) * itemsize

    out_flat = pl.pallas_call(
        kernel,
        out_shape=jax.ShapeDtypeStruct((NC, Ho, Wo), x.dtype),
        grid=(num_blocks,),
        in_specs=[pl.BlockSpec((TC, H, W), lambda i: (i, 0, 0))],
        out_specs=pl.BlockSpec((TC, Ho, Wo), lambda i: (i, 0, 0)),
        compiler_params=pltpu.CompilerParams(
            dimension_semantics=("parallel",),
            vmem_limit_bytes=vmem_limit,
        ),
        cost_estimate=pl.CostEstimate(
            flops=0, transcendentals=0, bytes_accessed=bytes_accessed),
    )(xf)

    return out_flat.reshape(N, C, Ho, Wo)


def global_pad_reference(x: jax.Array, pad=1) -> jax.Array:
    """Pure-JAX reference matching torch F.pad 'circular' then 'reflect'."""
    if isinstance(pad, int):
        ph = pw = pad
    else:
        ph, pw = pad
    x1 = jnp.pad(x, ((0, 0), (0, 0), (0, 0), (pw, pw)), mode="wrap")
    return jnp.pad(x1, ((0, 0), (0, 0), (ph, ph), (0, 0)), mode="reflect")


if __name__ == "__main__":
    key = jax.random.PRNGKey(0)
    x = jax.random.normal(key, (2, 4, 16, 16), dtype=jnp.float32)

    pad = 1  # Global(pad=1)
    out = global_pad(x, pad)
    out = jax.block_until_ready(out)

    ref = global_pad_reference(x, pad)
    assert out.shape == (2, 4, 18, 18), out.shape
    assert out.dtype == x.dtype
    assert jnp.allclose(out, ref), "mismatch vs reference padding"

    print("KERNEL_OK")
</pallas_src>

<mosaic_0001>
module attributes {stable_mosaic.version = 11 : i64} {
  func.func @kernel(%arg0: i32, %arg1: memref<4x16x16xf32, #tpu.memory_space<vmem>>, %arg2: memref<4x18x18xf32, #tpu.memory_space<vmem>>) attributes {dimension_semantics = [#tpu.dimension_semantics<parallel>], iteration_bounds = array<i64: 2>, scalar_prefetch = 0 : i64, scratch_operands = 0 : i64, tpu.core_type = #tpu.core_type<tc>, window_params = [{transform_indices = @transform_0, window_bounds = array<i64: 4, 16, 16>}, {transform_indices = @transform_1, window_bounds = array<i64: 4, 18, 18>}]} {
    %c0 = arith.constant 0 : index
    %c0_0 = arith.constant 0 : index
    %c15 = arith.constant 15 : index
    %0 = vector.load %arg1[%c0, %c0_0, %c15] : memref<4x16x16xf32, #tpu.memory_space<vmem>>, vector<4x16x1xf32>
    %c0_1 = arith.constant 0 : index
    %c0_2 = arith.constant 0 : index
    %c0_3 = arith.constant 0 : index
    %1 = vector.load %arg1[%c0_1, %c0_2, %c0_3] : memref<4x16x16xf32, #tpu.memory_space<vmem>>, vector<4x16x16xf32>
    %c0_4 = arith.constant 0 : index
    %c0_5 = arith.constant 0 : index
    %c0_6 = arith.constant 0 : index
    %2 = vector.load %arg1[%c0_4, %c0_5, %c0_6] : memref<4x16x16xf32, #tpu.memory_space<vmem>>, vector<4x16x1xf32>
    %3 = tpu.concatenate %0, %1, %2 in 2 : vector<4x16x1xf32>, vector<4x16x16xf32>, vector<4x16x1xf32> -> vector<4x16x18xf32>
    %c0_7 = arith.constant 0 : index
    %c1 = arith.constant 1 : index
    %c0_8 = arith.constant 0 : index
    %4 = vector.load %arg2[%c0_7, %c1, %c0_8] : memref<4x18x18xf32, #tpu.memory_space<vmem>>, vector<4x16x18xf32>
    tpu.vector_store %arg2[%c0_7, %c1, %c0_8], %3 {strides = array<i32>} : memref<4x18x18xf32, #tpu.memory_space<vmem>>, vector<4x16x18xf32>,
    %5 = vector.extract_strided_slice %3 {offsets = [0, 1, 0], sizes = [4, 1, 18], strides = [1, 1, 1]} : vector<4x16x18xf32> to vector<4x1x18xf32>
    %c0_9 = arith.constant 0 : index
    %c0_10 = arith.constant 0 : index
    %c0_11 = arith.constant 0 : index
    %6 = vector.load %arg2[%c0_9, %c0_10, %c0_11] : memref<4x18x18xf32, #tpu.memory_space<vmem>>, vector<4x1x18xf32>
    tpu.vector_store %arg2[%c0_9, %c0_10, %c0_11], %5 {strides = array<i32>} : memref<4x18x18xf32, #tpu.memory_space<vmem>>, vector<4x1x18xf32>,
    %7 = vector.extract_strided_slice %3 {offsets = [0, 14, 0], sizes = [4, 1, 18], strides = [1, 1, 1]} : vector<4x16x18xf32> to vector<4x1x18xf32>
    %c0_12 = arith.constant 0 : index
    %c17 = arith.constant 17 : index
    %c0_13 = arith.constant 0 : index
    %8 = vector.load %arg2[%c0_12, %c17, %c0_13] : memref<4x18x18xf32, #tpu.memory_space<vmem>>, vector<4x1x18xf32>
    tpu.vector_store %arg2[%c0_12, %c17, %c0_13], %7 {strides = array<i32>} : memref<4x18x18xf32, #tpu.memory_space<vmem>>, vector<4x1x18xf32>,
    return
  }
  func.func @transform_0(%arg0: i32) -> (i32, i32, i32) {
    %c0_i32 = arith.constant 0 : i32
    %c0_i32_0 = arith.constant 0 : i32
    %c0_i32_1 = arith.constant 0 : i32
    return %arg0, %c0_i32, %c0_i32_0 : i32, i32, i32
  }
  func.func @transform_1(%arg0: i32) -> (i32, i32, i32) {
    %c0_i32 = arith.constant 0 : i32
    %c0_i32_0 = arith.constant 0 : i32
    %c0_i32_1 = arith.constant 0 : i32
    return %arg0, %c0_i32, %c0_i32_0 : i32, i32, i32
  }
}

</mosaic_0001>

<bundles_post_ra>
// kernel: tpu_custom_call.1
= control target key start
LH: loop header
LB: loop body
LE: loop exit
PB: predicated region body
PF: predicated region fallthrough
CT: control target
= control target key end

     0   :  { %6 = vsyncpa [#allocation3], 0  ;;  %s621_s0 = inlined_call_operand.hbm [shape: f32[8,16,16], index: 0, kind: input, shape index: {}]   ;;  %s622_s1 = inlined_call_operand.vmem [shape: f32[8,18,18], index: 1, kind: output, shape index: {}]  }
   0x1   :  { %8 = vsyncpa [#allocation3 + $0x1], 0  ;;  %s480_s6 = smov 0   ;;  %s482_s7 = smov 0  }
   0x2   :  { %s484_s8 = smov 0   ;;  %s486_s9 = smov 0  }
   0x3 LB: > { %s338_s10 = sadd.s32 4294967295, %s463_s9   ;;  %s500_s11 = sadd.s32 1, %s463_s9   ;;  %s463_s9 = sphi %s486_s9, %s629_s9   ;;  %s459_s8 = sphi %s484_s8, %s628_s8   ;;  %s455_s7 = sphi %s482_s7, %s627_s7   ;;  %s451_s6 = sphi %s480_s6, %s626_s6  }
   0x4   : > { %s18_s12 = ssub.s32 %s463_s9, %s500_s11  ;;  %s21_s13 = sadd.s32 1, %s459_s8 }
   0x5   : > { %p19_p0 = scmp.eq.s32.totalorder %s18_s12, 0  ;;  %p28_p1 = scmp.ne.s32.totalorder %s459_s8, %s455_s7 }
   0x6   : > { %p29_p2 = scmp.eq.s32.totalorder %s463_s9, 0  ;;  %p34_p3 = scmp.ne.s32.totalorder %s455_s7, %s451_s6 }
   0x7   : > { %s510_s14 = scalar_select %p19_p0, %s459_s8, %s21_s13  }
   0x8   : > { %p512_p4 = por %p29_p2, %p28_p1  ;;  %p35_p5 = scmp.eq.s32.totalorder %s338_s10, 0 }
   0x9   : > { %p361_p6 = scmp.lt.s32.totalorder %s463_s9, 2  ;;  %s84_s17 = sand.u32 1, %s459_s8  }
   0xa   : > { %p519_p7 = por %p35_p5, %p34_p3  ;;  %s342_s18 = sshll.u32 %s84_s17, 6 }
   0xb   : > { %s353_s19 = sshll.u32 %s463_s9, 6  ;;  %s88_s23 = scalar_lea.vmem [#allocation2], %s342_s18 }
   0xc   : > { %s94_s22 = scalar_lea.hbm %s621_s0, %s353_s19  ;;  %s97_s24 = sshll.u32 %s88_s23, 4  ;;  %s98_s24 = int_to_ptr.vmem [resolvable:$true] %s97_s24 }
   0xd   : > { %s95_s25 = sshll.u32 %s94_s22, 4  ;;  %p530_p8 = pnand %p361_p6, %p512_p4  ;;  %s96_s25 = int_to_ptr.hbm [resolvable:$true] %s95_s25 }
   0xe   : > { %p346_p9 = scmp.ge.s32.totalorder %s463_s9, 1  ;;  %s85_s27 = scalar_lea.sflag [#allocation3], %s84_s17 }
   0xf   : > { %s399_s28 = sshra.s32 %s96_s25, 4  ;;  %p403_p11 = pneg %p530_p8  ;;  %s400_s28 = int_to_ptr.hbm [resolvable:$true] %s399_s28 }
  0x10   : > { %s401_s29 = scalar_lea.hbm %s400_s28, 64  ;;  %s406_s3 = scalar_lea.hbm %s621_s0, 128 }
  0x11   : > { %p402_p10 = scmp.ne.s32.totalorder %s400_s28, %s401_s29  ;;  %p407_p0 = scmp.lt.s32.totalorder %s400_s28, %s621_s0 }
  0x12   : > { %p408_p1 = scmp.lt.s32.totalorder %s406_s3, %s401_s29 }
  0x13   : > { %p404_p12 = pnand %p403_p11, %p402_p10 }
  0x14   : > { %p409_p2 = por %p408_p1, %p407_p0 }
  0x15   : > { %p405_p13 = pneg %p404_p12 }
  0x17   : > { %p410_p3 = pnand %p409_p2, %p405_p13 }
  0x19   : > { %413 = shalt.err (!%p410_p3)
}
  0x1a   : > { %s465_s6 = smov 128   ;;  %s466_s12 = smov 8  }
  0x1b   : > { %360 = dma.hbm_to_vmem [thread:$0]  (!%p530_p8), %s96_s25, 1024, %s98_s24, %s85_s27, %s465_s6, %s465_s6, %s466_s12  }
  0x1c   : > { %p105_p4 = scmp.lt.s32.totalorder %s463_s9, 3 }
  0x1e   : > { %p106_p5 = pnand %p346_p9, %p105_p4 }
  0x1f   : > { %s111_s13 = sand.u32 (!%p106_p5), 1, %s455_s7  }
  0x20   : > { %109 = sbr.rel (%p106_p5) target bundleno = 215 (0xd7), region = 24  ;;  %s347_s15 = sshll.u32 (!%p106_p5), %s111_s13, 6 }
  0x21   : > { %s112_s17 = scalar_lea.sflag (!%p106_p5), [#allocation3], %s111_s13  ;;  %s115_s18 = scalar_lea.vmem (!%p106_p5), [#allocation2], %s347_s15 }
  0x25   : > { %446 = dma.done.wait (%p519_p7), %s112_s17, 1024  }
  0x26   : > { %448 = vsyncadd (%p519_p7), %s112_s17, 4294966272  ;;  %v148_v0 = vld [vmem:[%s115_s18 + $0x20] sm:$0xff]  ;;  %v146_v1 = vld [vmem:[%s115_s18 + $0x10] sm:$0xff]  ;;  %s467_s19 = smov 113   ;;  %s468_s20 = smov 1   ;;  %vm232_vm0 = vcmask 7168  }
  0x27   : > { %v144_v2 = vld [vmem:[%s115_s18] sm:$0xff]  ;;  %168 = vrot.lane.b32.xlu2 %v148_v0, %s467_s19  ;;  %164 = vrot.lane.b32.xlu1 %v146_v1, %s467_s19  ;;  %v149_v3 = vld [vmem:[%s115_s18 + $0x28] sm:$0xff]  ;;  %s469_s16 = smov 17   ;;  %s348_s21 = sshll.u32 %s338_s10, 2  ;;  %vm241_vm1 = vcmask 138240   ;;  %vm250_vm2 = vcmask 146432  }
  0x28   : > { %160 = vrot.lane.b32.xlu0 %v144_v2, %s467_s19  ;;  %v147_v4 = vld [vmem:[%s115_s18 + $0x18] sm:$0xff]  ;;  %v145_v5 = vld [vmem:[%s115_s18 + $0x8] sm:$0xff]  ;;  %v150_v7 = vld [vmem:[%s115_s18 + $0x30] sm:$0xff]  ;;  %p138_p6 = scmp.lt.s32.totalorder %s348_s21, 7  ;;  %vm264_vm3 = vcmask 145414   ;;  %vm259_vm4 = vcmask 140289  }
  0x29   : > { %v151_v6 = vld [vmem:[%s115_s18 + $0x38] sm:$0xff] }
  0x2a   : > { %s631_s21 = smov (!%p138_p6, %s348_s21), 7 }
  0x2b   : > { %s354_s22 = smul.u32 24, %s631_s21 }
  0x2d   : > { %s558_s25 = scalar_lea.vmem %s622_s1, %s354_s22 }
  0x2f   : > { %170 = vrot.lane.b32.xlu2 %v149_v3, %s467_s19  ;;  %166 = vrot.lane.b32.xlu1 %v147_v4, %s467_s19 }
  0x30   : > { %162 = vrot.lane.b32.xlu0 %v145_v5, %s467_s19 }
  0x37   : > { %174 = vrot.lane.b32.xlu1 %v151_v6, %s467_s19  ;;  %184 = vrot.lane.b32.xlu2 %v144_v2, %s468_s20 }
  0x38   : > { %172 = vrot.lane.b32.xlu0 %v150_v7, %s467_s19 }
  0x3f   : > { %188 = vrot.lane.b32.xlu1 %v146_v1, %s468_s20  ;;  %190 = vrot.lane.b32.xlu2 %v147_v4, %s468_s20 }
  0x40   : > { %186 = vrot.lane.b32.xlu0 %v145_v5, %s468_s20 }
  0x47   : > { %210 = vrot.lane.b32.xlu1 %v145_v5, %s469_s16  ;;  %192 = vrot.lane.b32.xlu2 %v148_v0, %s468_s20 }
  0x48   : > { %208 = vrot.lane.b32.xlu0 %v144_v2, %s469_s16 }
  0x4f   : > { %212 = vrot.lane.b32.xlu1 %v146_v1, %s469_s16  ;;  %214 = vrot.lane.b32.xlu2 %v147_v4, %s469_s16 }
  0x50   : > { %194 = vrot.lane.b32.xlu0 %v149_v3, %s468_s20 }
  0x57   : > { %198 = vrot.lane.b32.xlu1 %v151_v6, %s468_s20  ;;  %216 = vrot.lane.b32.xlu2 %v148_v0, %s469_s16 }
  0x58   : > { %196 = vrot.lane.b32.xlu0 %v150_v7, %s468_s20 }
  0x5f   : > { %220 = vrot.lane.b32.xlu1 %v150_v7, %s469_s16  ;;  %222 = vrot.lane.b32.xlu2 %v151_v6, %s469_s16 }
  0x60   : > { %218 = vrot.lane.b32.xlu0 %v149_v3, %s469_s16 }
  0x81   : > { %v169_v8 = vpop.permute.xlu2 %168 }
  0x89   : > { %v171_v9 = vpop.permute.xlu2 %170 }
  0x91   : > { %v185_v10 = vpop.permute.xlu2 %184 }
  0x99   : > { %v165_v11 = vpop.permute.xlu1 %164  ;;  %v191_v15 = vpop.permute.xlu2 %190 }
  0x9a   : > { %v161_v12 = vpop.permute.xlu0 %160 }
  0x9b   : > { %v233_v27 = vsel %vm232_vm0, %v161_v12, %v185_v10 }
  0xa1   : > { %v167_v13 = vpop.permute.xlu1 %166  ;;  %v193_v18 = vpop.permute.xlu2 %192 }
  0xa2   : > { %v163_v14 = vpop.permute.xlu0 %162  ;;  %v236_v24 = vsel %vm232_vm0, %v167_v13, %v191_v15  ;;  %v237_v35 = vsel %vm232_vm0, %v169_v8, %v193_v18 }
  0xa9   : > { %v175_v16 = vpop.permute.xlu1 %174  ;;  %v215_v21 = vpop.permute.xlu2 %214 }
  0xaa   : > { %v173_v17 = vpop.permute.xlu0 %172  ;;  %v245_v28 = vsel %vm241_vm1, %v236_v24, %v215_v21 }
  0xab   : > { %254 = vst.msk [vmem:[%s558_s25 + $0x21] sm:$0xff] %vm250_vm2, %v245_v28 }
  0xac   : > { %266 = vst.msk [vmem:[%s558_s25 + $0x23] sm:$0x40] %vm264_vm3, %v245_v28 }
  0xb1   : > { %v189_v19 = vpop.permute.xlu1 %188  ;;  %v217_v31 = vpop.permute.xlu2 %216 }
  0xb2   : > { %v187_v20 = vpop.permute.xlu0 %186  ;;  %v235_v30 = vsel %vm232_vm0, %v165_v11, %v189_v19  ;;  %v246_v36 = vsel %vm241_vm1, %v237_v35, %v217_v31 }
  0xb3   : > { %v234_v22 = vsel %vm232_vm0, %v163_v14, %v187_v20  ;;  %255 = vst.msk [vmem:[%s558_s25 + $0x31] sm:$0xff] %vm250_vm2, %v246_v36 }
  0xb4   : > { %262 = vst.msk [vmem:[%s558_s25 + $0x2f] sm:$0x2] %vm259_vm4, %v246_v36 }
  0xb9   : > { %v211_v23 = vpop.permute.xlu1 %210  ;;  %v223_v43 = vpop.permute.xlu2 %222 }
  0xba   : > { %v243_v25 = vsel %vm241_vm1, %v234_v22, %v211_v23  ;;  %v209_v26 = vpop.permute.xlu0 %208 }
  0xbb   : > { %252 = vst.msk [vmem:[%s558_s25 + $0x9] sm:$0xff] %vm250_vm2, %v243_v25  ;;  %v242_v29 = vsel %vm241_vm1, %v233_v27, %v209_v26 }
  0xbc   : > { %265 = vst.msk [vmem:[%s558_s25 + $0xb] sm:$0x40] %vm264_vm3, %v243_v25 }
  0xbd   : > { %251 = vst.msk [vmem:[%s558_s25 + $0x1] sm:$0xff] %vm250_vm2, %v242_v29 }
  0xbe   : > { %260 = vst.msk [vmem:[%s558_s25 - $0x1] sm:$0x2] %vm259_vm4, %v242_v29 }
  0xc1   : > { %v213_v32 = vpop.permute.xlu1 %212 }
  0xc2   : > { %v244_v33 = vsel %vm241_vm1, %v235_v30, %v213_v32  ;;  %v195_v34 = vpop.permute.xlu0 %194 }
  0xc3   : > { %253 = vst.msk [vmem:[%s558_s25 + $0x19] sm:$0xff] %vm250_vm2, %v244_v33  ;;  %v238_v41 = vsel %vm232_vm0, %v171_v9, %v195_v34 }
  0xc4   : > { %261 = vst.msk [vmem:[%s558_s25 + $0x17] sm:$0x2] %vm259_vm4, %v244_v33 }
  0xc9   : > { %v199_v37 = vpop.permute.xlu1 %198 }
  0xca   : > { %v197_v38 = vpop.permute.xlu0 %196  ;;  %v240_v42 = vsel %vm232_vm0, %v175_v16, %v199_v37 }
  0xcb   : > { %v239_v39 = vsel %vm232_vm0, %v173_v17, %v197_v38  ;;  %v249_v47 = vsel %vm241_vm1, %v240_v42, %v223_v43 }
  0xcc   : > { %258 = vst.msk [vmem:[%s558_s25 + $0x51] sm:$0xff] %vm250_vm2, %v249_v47 }
  0xcd   : > { %268 = vst.msk [vmem:[%s558_s25 + $0x53] sm:$0x40] %vm264_vm3, %v249_v47 }
  0xd1   : > { %v221_v40 = vpop.permute.xlu1 %220 }
  0xd2   : > { %v248_v44 = vsel %vm241_vm1, %v239_v39, %v221_v40  ;;  %v219_v45 = vpop.permute.xlu0 %218 }
  0xd3   : > { %257 = vst.msk [vmem:[%s558_s25 + $0x49] sm:$0xff] %vm250_vm2, %v248_v44  ;;  %v247_v46 = vsel %vm241_vm1, %v238_v41, %v219_v45 }
  0xd4   : > { %263 = vst.msk [vmem:[%s558_s25 + $0x47] sm:$0x2] %vm259_vm4, %v248_v44 }
  0xd5   : > { %256 = vst.msk [vmem:[%s558_s25 + $0x39] sm:$0xff] %vm250_vm2, %v247_v46 }
  0xd6   : > { %267 = vst.msk [vmem:[%s558_s25 + $0x3b] sm:$0x40] %vm264_vm3, %v247_v46 }
  0xd7 PF: > { %p11_p7 = scmp.ge.s32.totalorder %s500_s11, 4   ;;  %s626_s6 = smov %s455_s7 }
  0xd8   : > { %s627_s7 = smov %s459_s8  ;;  %s628_s8 = smov %s510_s14 }
  0xd9   : > { %s629_s9 = smov %s500_s11  ;;  %13 = sbr.rel (!%p11_p7) target bundleno = 3 (0x3), region = 64 }
  0xde   :  { %293 = vsyncpa [#allocation3], 1 }
  0xdf   :  { %295 = vsyncpa [#allocation3 + $0x1], 1 }

</bundles_post_ra>
